<compile_context>
chip_gen: v5e
topology: v5e:2x2
jax: 0.10.0
libtpu: 0.0.40
codegen_flags: <defaults>
</compile_context>

<pallas_src>
import functools

import jax
import jax.numpy as jnp
from jax import lax
from jax.experimental import pallas as pl
from jax.experimental.pallas import tpu as pltpu


# ---------------------------------------------------------------------------
# Hardware-aware budgets
# ---------------------------------------------------------------------------

@functools.lru_cache(maxsize=None)
def _vmem_capacity_bytes():
    try:
        cap = int(pltpu.get_tpu_info().vmem_capacity_bytes)
        if cap > 0:
            return cap
    except Exception:
        pass
    return 128 << 20          # v5e / v6e default


@functools.lru_cache(maxsize=None)
def _budgets():
    """Returns (tile_bytes, tiled_vmem_limit, fast_path_f32_bytes, fast_vmem_limit)."""
    cap = _vmem_capacity_bytes()
    limit_cap = max(32 << 20, cap - (16 << 20))   # headroom for Mosaic scratch
    if cap >= (100 << 20):       # v5e / v6e: 128 MiB physical VMEM
        tile_bytes = 4 << 20
        fast_in_f32 = 12 << 20
    else:                        # v7x: 64 MiB physical VMEM per TensorCore
        tile_bytes = 3 << 20
        fast_in_f32 = 8 << 20
    tiled_limit = min(limit_cap, 64 << 20)
    fast_limit = min(limit_cap, 100 << 20)
    return tile_bytes, tiled_limit, fast_in_f32, fast_limit


def _pick_spatial_tile(c, spatial, tile_bytes):
    """Spatial tile: ~tile_bytes of f32 per x tile, multiple of 128 lanes."""
    if spatial <= 512:
        return spatial                       # full row -> no (8,128) issue
    c_pad = ((c + 7) // 8) * 8               # f32 sublane padding of the C axis
    tl = (tile_bytes // (4 * c_pad)) // 128 * 128
    tl = max(512, tl)
    if tl >= spatial:
        return spatial
    return tl


# ---------------------------------------------------------------------------
# Tiled path (general shapes): stats-reduce kernel + apply kernel
# ---------------------------------------------------------------------------

def _stats_kernel(x_ref, sum_ref, sq_ref, *, spatial, tl, tiles_per_chunk,
                  num_l, needs_mask):
    """Accumulate per-channel sum and sum-of-squares over spatial tiles.

    Grid: (N, P, tiles_per_chunk). x_ref is a (C, tl) tile; sum_ref/sq_ref are
    (C, 1) f32 accumulators resident across the last ("arbitrary") grid axis.
    """
    p = pl.program_id(1)
    l = pl.program_id(2)

    @pl.when(l == 0)
    def _():
        sum_ref[...] = jnp.zeros_like(sum_ref)
        sq_ref[...] = jnp.zeros_like(sq_ref)

    gl = p * tiles_per_chunk + l           # global spatial-tile index

    def _accum(x):
        sum_ref[...] += jnp.sum(x, axis=1, keepdims=True)      # (C, 1)
        sq_ref[...] += jnp.sum(x * x, axis=1, keepdims=True)   # (C, 1)

    if not needs_mask:
        _accum(x_ref[...].astype(jnp.float32))
    else:
        num_full = spatial // tl           # tiles fully in bounds

        @pl.when(gl < num_full)            # bulk tiles: no mask work
        def _():
            _accum(x_ref[...].astype(jnp.float32))

        @pl.when(gl >= num_full)           # tail / over-split tiles: mask lanes
        def _():
            x = x_ref[...].astype(jnp.float32)
            lane = lax.broadcasted_iota(jnp.int32, x.shape, 1)
            x = jnp.where(lane < (spatial - gl * tl), x, 0.0)
            _accum(x)


def _apply_kernel(x_ref, params_ref, o_ref):
    """out = PReLU(x * scale + bias) on a (C, tl) tile.

    params_ref: (C, 3) with columns [scale, bias, alpha].
    """
    x = x_ref[...].astype(jnp.float32)                        # (C, tl)
    scale = params_ref[:, 0:1]                                # (C, 1) broadcasts
    bias = params_ref[:, 1:2]
    alpha = params_ref[:, 2:3]
    y = x * scale + bias
    o_ref[...] = jnp.where(y >= 0.0, y, alpha * y).astype(o_ref.dtype)


def _bnprelu_tiled(x3d, gamma, beta, alpha, eps, tile_bytes, vmem_limit):
    n, c, spatial = x3d.shape
    tl = _pick_spatial_tile(c, spatial, tile_bytes)
    num_l = pl.cdiv(spatial, tl)

    # Spatial-reduction split: gives pass 1 a second "parallel" axis so both
    # TensorCores are busy on v7x even when N == 1. Degenerates to 1 otherwise.
    p_split = 2 if (n < 2 and num_l >= 2) else 1
    tiles_per_chunk = pl.cdiv(num_l, p_split)
    needs_mask = (spatial % tl != 0) or (p_split * tiles_per_chunk > num_l)

    if p_split == 1:
        x_idx1 = lambda i, p, l: (i, 0, l)
    else:
        # Clamp the global tile index; over-split tiles are fully masked to 0
        # inside the kernel, so the clamped (re-read) block contributes nothing.
        x_idx1 = lambda i, p, l: (
            i, 0, jnp.minimum(p * tiles_per_chunk + l, num_l - 1))

    x_bytes = x3d.size * x3d.dtype.itemsize

    # Pass 1: per-(n, p, c) partial [sum, sum_sq]. N and P are megacore
    # parallel, the spatial axis is the resident-accumulator ("arbitrary") axis.
    sums, sqs = pl.pallas_call(
        functools.partial(_stats_kernel, spatial=spatial, tl=tl,
                          tiles_per_chunk=tiles_per_chunk, num_l=num_l,
                          needs_mask=needs_mask),
        out_shape=(jax.ShapeDtypeStruct((n, p_split, c, 1), jnp.float32),
                   jax.ShapeDtypeStruct((n, p_split, c, 1), jnp.float32)),
        grid=(n, p_split, tiles_per_chunk),
        in_specs=[pl.BlockSpec((None, c, tl), x_idx1)],
        out_specs=[pl.BlockSpec((None, None, c, 1), lambda i, p, l: (i, p, 0, 0)),
                   pl.BlockSpec((None, None, c, 1), lambda i, p, l: (i, p, 0, 0))],
        compiler_params=pltpu.CompilerParams(
            dimension_semantics=("parallel", "parallel", "arbitrary"),
            vmem_limit_bytes=vmem_limit),
        cost_estimate=pl.CostEstimate(
            flops=3 * x3d.size, transcendentals=0,
            bytes_accessed=x_bytes + 8 * n * p_split * c),
    )(x3d)

    # Tiny glue on (C,)-sized arrays: fold N and the spatial split, form
    # per-channel scale/bias once.
    # Note: variance is E[x^2] - E[x]^2 in f32 (clamped); fine for typical
    # activation ranges, would need a shifted/two-pass form for huge offsets.
    count = float(n * spatial)
    tot_sum = jnp.sum(sums[..., 0], axis=(0, 1))              # (C,)
    tot_sq = jnp.sum(sqs[..., 0], axis=(0, 1))                # (C,)
    mean = tot_sum / count
    var = jnp.maximum(tot_sq / count - mean * mean, 0.0)
    inv_std = lax.rsqrt(var + eps)
    scale = gamma.astype(jnp.float32) * inv_std               # (C,)
    bias = beta.astype(jnp.float32) - mean * scale            # (C,)
    params = jnp.stack([scale, bias, alpha.astype(jnp.float32)], axis=1)  # (C,3)

    # Pass 2: elementwise normalize + PReLU. Fully parallel, pipelined grid.
    out3d = pl.pallas_call(
        _apply_kernel,
        out_shape=jax.ShapeDtypeStruct(x3d.shape, x3d.dtype),
        grid=(n, num_l),
        in_specs=[
            pl.BlockSpec((None, c, tl), lambda i, l: (i, 0, l)),
            pl.BlockSpec((c, 3), lambda i, l: (0, 0)),
        ],
        out_specs=pl.BlockSpec((None, c, tl), lambda i, l: (i, 0, l)),
        compiler_params=pltpu.CompilerParams(
            dimension_semantics=("parallel", "parallel"),
            vmem_limit_bytes=vmem_limit),
        cost_estimate=pl.CostEstimate(
            flops=3 * x3d.size, transcendentals=0,
            bytes_accessed=2 * x_bytes),
    )(x3d, params)
    return out3d


# ---------------------------------------------------------------------------
# Fast path (tensor resident in VMEM): single fused kernel, x read once
# ---------------------------------------------------------------------------

def _fused_kernel(x_ref, gamma_ref, beta_ref, alpha_ref, o_ref, *, eps):
    x = x_ref[...].astype(jnp.float32)                        # (N, C, L)
    count = x.shape[0] * x.shape[2]
    s = jnp.sum(jnp.sum(x, axis=2, keepdims=True), axis=0, keepdims=True)
    sq = jnp.sum(jnp.sum(x * x, axis=2, keepdims=True), axis=0, keepdims=True)
    mean = s * (1.0 / count)                                  # (1, C, 1)
    var = jnp.maximum(sq * (1.0 / count) - mean * mean, 0.0)
    scale = gamma_ref[...] * lax.rsqrt(var + eps)             # (1, C, 1)
    bias = beta_ref[...] - mean * scale
    y = x * scale + bias
    o_ref[...] = jnp.where(y >= 0.0, y, alpha_ref[...] * y).astype(o_ref.dtype)


def bnprelu(x_nchw, gamma, beta, alpha, *, eps=1e-3, force_tiled=False,
            tile_bytes=None):
    """BNPReLU forward. x_nchw: (N, C, H, W); gamma/beta/alpha: (C,)."""
    n, c, h, w = x_nchw.shape
    spatial = h * w
    x3d = x_nchw.reshape(n, c, spatial)          # free reshape, no transpose

    tile_target, tiled_limit, fast_in_f32, fast_limit = _budgets()
    if tile_bytes is None:
        tile_bytes = tile_target

    # Fused single-block path: 2x HBM traffic (1 read + 1 write) instead of 3x.
    f32_footprint = x_nchw.size * 4
    if f32_footprint <= fast_in_f32 and not force_tiled:
        g = gamma.astype(jnp.float32).reshape(1, c, 1)
        b = beta.astype(jnp.float32).reshape(1, c, 1)
        a = alpha.astype(jnp.float32).reshape(1, c, 1)
        out3d = pl.pallas_call(
            functools.partial(_fused_kernel, eps=eps),
            out_shape=jax.ShapeDtypeStruct(x3d.shape, x3d.dtype),
            in_specs=[
                pl.BlockSpec((n, c, spatial), lambda: (0, 0, 0)),
                pl.BlockSpec((1, c, 1), lambda: (0, 0, 0)),
                pl.BlockSpec((1, c, 1), lambda: (0, 0, 0)),
                pl.BlockSpec((1, c, 1), lambda: (0, 0, 0)),
            ],
            out_specs=pl.BlockSpec((n, c, spatial), lambda: (0, 0, 0)),
            compiler_params=pltpu.CompilerParams(vmem_limit_bytes=fast_limit),
        )(x3d, g, b, a)
    else:
        out3d = _bnprelu_tiled(x3d, gamma, beta, alpha, eps, tile_bytes,
                               tiled_limit)

    return out3d.reshape(n, c, h, w)


# ---------------------------------------------------------------------------
# Reference + test
# ---------------------------------------------------------------------------

def _reference(x_nchw, gamma, beta, alpha, *, eps=1e-3):
    x = x_nchw.astype(jnp.float32)
    mean = jnp.mean(x, axis=(0, 2, 3), keepdims=True)
    var = jnp.mean((x - mean) ** 2, axis=(0, 2, 3), keepdims=True)
    y = (x - mean) / jnp.sqrt(var + eps)
    y = y * gamma[None, :, None, None] + beta[None, :, None, None]
    a = alpha[None, :, None, None]
    return jnp.where(y >= 0, y, a * y).astype(x_nchw.dtype)


def _make_params(key, c):
    kg, kb, ka = jax.random.split(key, 3)
    gamma = 1.0 + 0.1 * jax.random.normal(kg, (c,), dtype=jnp.float32)
    beta = 0.1 * jax.random.normal(kb, (c,), dtype=jnp.float32)
    alpha = jnp.full((c,), 0.25, dtype=jnp.float32) \
        + 0.01 * jax.random.normal(ka, (c,), dtype=jnp.float32)
    return gamma, beta, alpha


if __name__ == "__main__":
    key = jax.random.PRNGKey(0)
    kx, kp, kx2, kp2, kx3, kp3 = jax.random.split(key, 6)

    # Small shape consistent with the module: batch=2, channels=4, 16x16.
    N, C, H, W = 2, 4, 16, 16
    x = jax.random.normal(kx, (N, C, H, W), dtype=jnp.float32)
    gamma, beta, alpha = _make_params(kp, C)
    ref = _reference(x, gamma, beta, alpha)

    # Path 1: fused single-block fast path.
    out_fast = jax.block_until_ready(bnprelu(x, gamma, beta, alpha))
    assert out_fast.shape == (N, C, H, W)
    assert jnp.max(jnp.abs(out_fast - ref)) < 1e-4

    # Path 2: tiled two-pass path on the same input (single spatial tile).
    out_tiled = jax.block_until_ready(
        bnprelu(x, gamma, beta, alpha, force_tiled=True))
    assert jnp.max(jnp.abs(out_tiled - ref)) < 1e-4

    # Path 3: tiled path with multiple spatial tiles and a masked tail
    # (spatial = 48*48 = 2304, forced tl = 512 -> 4 full tiles + padded 256).
    N2, C2, H2, W2 = 2, 8, 48, 48
    x2 = jax.random.normal(kx2, (N2, C2, H2, W2), dtype=jnp.float32)
    gamma2, beta2, alpha2 = _make_params(kp2, C2)
    out2 = jax.block_until_ready(
        bnprelu(x2, gamma2, beta2, alpha2, force_tiled=True,
                tile_bytes=512 * 4 * C2))
    ref2 = _reference(x2, gamma2, beta2, alpha2)
    assert jnp.max(jnp.abs(out2 - ref2)) < 1e-4

    # Path 4: N == 1 exercises the spatial-split ("parallel" P axis) stats
    # pass, including clamped over-split tiles and the masked tail.
    N3, C3, H3, W3 = 1, 8, 48, 48
    x3 = jax.random.normal(kx3, (N3, C3, H3, W3), dtype=jnp.float32)
    gamma3, beta3, alpha3 = _make_params(kp3, C3)
    out3 = jax.block_until_ready(
        bnprelu(x3, gamma3, beta3, alpha3, force_tiled=True,
                tile_bytes=512 * 4 * C3))
    ref3 = _reference(x3, gamma3, beta3, alpha3)
    assert jnp.max(jnp.abs(out3 - ref3)) < 1e-4

    print("KERNEL_OK")
</pallas_src>

<mosaic_0001>
module attributes {stable_mosaic.version = 11 : i64} {
  func.func @_fused_kernel(%arg0: memref<2x4x256xf32, #tpu.memory_space<vmem>>, %arg1: memref<1x4x1xf32, #tpu.memory_space<vmem>>, %arg2: memref<1x4x1xf32, #tpu.memory_space<vmem>>, %arg3: memref<1x4x1xf32, #tpu.memory_space<vmem>>, %arg4: memref<2x4x256xf32, #tpu.memory_space<vmem>>) attributes {dimension_semantics = [], scalar_prefetch = 0 : i64, scratch_operands = 0 : i64, tpu.core_type = #tpu.core_type<tc>} {
    %c0 = arith.constant 0 : index
    %c0_0 = arith.constant 0 : index
    %c0_1 = arith.constant 0 : index
    %0 = vector.load %arg0[%c0, %c0_0, %c0_1] : memref<2x4x256xf32, #tpu.memory_space<vmem>>, vector<2x4x256xf32>
    %cst = arith.constant dense<0.000000e+00> : vector<2x4xf32>
    %1 = vector.multi_reduction <add>, %0, %cst [2] : vector<2x4x256xf32> to vector<2x4xf32>
    %2 = vector.shape_cast %1 : vector<2x4xf32> to vector<2x4x1xf32>
    %cst_2 = arith.constant dense<0.000000e+00> : vector<4x1xf32>
    %3 = vector.multi_reduction <add>, %2, %cst_2 [0] : vector<2x4x1xf32> to vector<4x1xf32>
    %4 = vector.shape_cast %3 : vector<4x1xf32> to vector<1x4x1xf32>
    %5 = arith.mulf %0, %0 : vector<2x4x256xf32>
    %cst_3 = arith.constant dense<0.000000e+00> : vector<2x4xf32>
    %6 = vector.multi_reduction <add>, %5, %cst_3 [2] : vector<2x4x256xf32> to vector<2x4xf32>
    %7 = vector.shape_cast %6 : vector<2x4xf32> to vector<2x4x1xf32>
    %cst_4 = arith.constant dense<0.000000e+00> : vector<4x1xf32>
    %8 = vector.multi_reduction <add>, %7, %cst_4 [0] : vector<2x4x1xf32> to vector<4x1xf32>
    %9 = vector.shape_cast %8 : vector<4x1xf32> to vector<1x4x1xf32>
    %cst_5 = arith.constant 0.001953125 : f32
    %10 = vector.broadcast %cst_5 : f32 to vector<1x4x1xf32>
    %11 = arith.mulf %4, %10 : vector<1x4x1xf32>
    %cst_6 = arith.constant 0.001953125 : f32
    %12 = vector.broadcast %cst_6 : f32 to vector<1x4x1xf32>
    %13 = arith.mulf %9, %12 : vector<1x4x1xf32>
    %14 = arith.mulf %11, %11 : vector<1x4x1xf32>
    %15 = arith.subf %13, %14 : vector<1x4x1xf32>
    %cst_7 = arith.constant 0.000000e+00 : f32
    %16 = vector.broadcast %cst_7 : f32 to vector<1x4x1xf32>
    %17 = arith.maximumf %15, %16 : vector<1x4x1xf32>
    %c0_8 = arith.constant 0 : index
    %c0_9 = arith.constant 0 : index
    %c0_10 = arith.constant 0 : index
    %18 = vector.load %arg1[%c0_8, %c0_9, %c0_10] : memref<1x4x1xf32, #tpu.memory_space<vmem>>, vector<1x4x1xf32>
    %cst_11 = arith.constant 1.000000e-03 : f32
    %19 = vector.broadcast %cst_11 : f32 to vector<1x4x1xf32>
    %20 = arith.addf %17, %19 : vector<1x4x1xf32>
    %21 = math.rsqrt %20 : vector<1x4x1xf32>
    %22 = arith.mulf %18, %21 : vector<1x4x1xf32>
    %c0_12 = arith.constant 0 : index
    %c0_13 = arith.constant 0 : index
    %c0_14 = arith.constant 0 : index
    %23 = vector.load %arg2[%c0_12, %c0_13, %c0_14] : memref<1x4x1xf32, #tpu.memory_space<vmem>>, vector<1x4x1xf32>
    %24 = arith.mulf %11, %22 : vector<1x4x1xf32>
    %25 = arith.subf %23, %24 : vector<1x4x1xf32>
    %26 = vector.broadcast %22 : vector<1x4x1xf32> to vector<2x4x256xf32>
    %27 = arith.mulf %0, %26 : vector<2x4x256xf32>
    %28 = vector.broadcast %25 : vector<1x4x1xf32> to vector<2x4x256xf32>
    %29 = arith.addf %27, %28 : vector<2x4x256xf32>
    %cst_15 = arith.constant 0.000000e+00 : f32
    %30 = vector.broadcast %cst_15 : f32 to vector<2x4x256xf32>
    %31 = arith.cmpf oge, %29, %30 : vector<2x4x256xf32>
    %c0_16 = arith.constant 0 : index
    %c0_17 = arith.constant 0 : index
    %c0_18 = arith.constant 0 : index
    %32 = vector.load %arg3[%c0_16, %c0_17, %c0_18] : memref<1x4x1xf32, #tpu.memory_space<vmem>>, vector<1x4x1xf32>
    %33 = vector.broadcast %32 : vector<1x4x1xf32> to vector<2x4x256xf32>
    %34 = arith.mulf %33, %29 : vector<2x4x256xf32>
    %35 = arith.select %31, %29, %34 : vector<2x4x256xi1>, vector<2x4x256xf32>
    %c0_19 = arith.constant 0 : index
    %c0_20 = arith.constant 0 : index
    %c0_21 = arith.constant 0 : index
    %36 = vector.load %arg4[%c0_19, %c0_20, %c0_21] : memref<2x4x256xf32, #tpu.memory_space<vmem>>, vector<2x4x256xf32>
    tpu.vector_store %arg4[%c0_19, %c0_20, %c0_21], %35 {strides = array<i32>} : memref<2x4x256xf32, #tpu.memory_space<vmem>>, vector<2x4x256xf32>,
    return
  }
}

</mosaic_0001>

<bundles_post_ra>
// kernel: tpu_custom_call.1
= control target key start
LH: loop header
LB: loop body
LE: loop exit
PB: predicated region body
PF: predicated region fallthrough
CT: control target
= control target key end

     0   :  { %9 = vsyncpa [#allocation3], 0  ;;  %s332_s0 = inlined_call_operand.hbm [shape: f32[2,4,256], index: 0, kind: input, shape index: {}]   ;;  %s333_s1 = inlined_call_operand.vmem [shape: f32[1,4,1], index: 1, kind: input, shape index: {}]   ;;  %s334_s2 = inlined_call_operand.vmem [shape: f32[1,4,1], index: 2, kind: input, shape index: {}]   ;;  %s335_s3 = inlined_call_operand.vmem [shape: f32[1,4,1], index: 3, kind: input, shape index: {}]   ;;  %s336_s4 = inlined_call_operand.hbm [shape: f32[2,4,256], index: 4, kind: output, shape index: {}]  }
   0x1   :  { %10 = vsyncpa [#allocation4], 0  ;;  %s15_s17 = sshll.u32 %s332_s0, 4  ;;  %s254_s18 = smov [#allocation2]   ;;  %s16_s17 = int_to_ptr.hbm [resolvable:$true] %s15_s17 }
   0x2   :  { %s17_s19 = sshll.u32 %s254_s18, 4  ;;  %s255_s20 = smov 128   ;;  %s18_s19 = int_to_ptr.vmem [resolvable:$true] %s17_s19 }
   0x3   :  { %s256_s21 = smov 8  }
   0x4   :  { %23 = dma.hbm_to_vmem [thread:$0]  %s16_s17, 256, %s18_s19, [#allocation3], %s255_s20, %s255_s20, %s256_s21  }
   0x5   :  { %250 = dma.done.wait [#allocation3], 256  }
   0x6   :  { %251 = vsyncadd [#allocation3], 4294967040  ;;  %v291_v0 = vld [vmem:[#allocation2] sm:$0xff]  ;;  %v293_v1 = vld [vmem:[#allocation2 + $0x8] sm:$0xff]  ;;  %vm49_vm0 = vcmask 1043456   ;;  %v257_v26 = vmov 0  }
   0x7   :  { %38 = vst [vmem:[#allocation1] ss:$2 sm:$0xff] %v291_v0  ;;  %v63_v2 = vmul.f32 %v291_v0, %v291_v0  ;;  %v64_v3 = vmul.f32 %v293_v1, %v293_v1  ;;  %v136_v25 = vld [vmem:[%s335_s3] sm:$0xf]  ;;  %199 = vset.pattern.permute.xlu0 %v257_v26  ;;  %198 = vset.pattern.permute.xlu2 %v257_v26  ;;  %v258_v54 = vmov 839922192  }
   0x8   :  { %42 = vst [vmem:[#allocation1 + $0x10] ss:$2 sm:$0xff] %v293_v1  ;;  %v96_v47 = vld [vmem:[%s333_s1] sm:$0xf]  ;;  %v117_v55 = vunpack.c.l.s4 %v258_v54  ;;  %s259_s1 = smov [#allocation5]   ;;  %s179_s28 = sshll.u32 %s336_s4, 4  ;;  %s180_s28 = int_to_ptr.hbm [resolvable:$true] %s179_s28 }
   0x9   :  { %v109_v52 = vld [vmem:[%s334_s2] sm:$0xf]  ;;  %s177_s2 = sshll.u32 %s259_s1, 4  ;;  %s178_s2 = int_to_ptr.vmem [resolvable:$true] %s177_s2 }
   0xa   :  { %v118_v57 = vunpack.c.0.s8 %v117_v55 }
   0xe   :  { %v39_v4 = vld.sshfl [vmem:[#allocation1] sm:$0xff pattern:$0x75316420]  ;;  %v40_v5 = vld.sshfl [vmem:[#allocation1 + $0x8] sm:$0xff pattern:$0x75316420] }
   0xf   :  { %v50_v6 = vsel %vm49_vm0, %v39_v4, 0.0  ;;  %v51_v7 = vsel %vm49_vm0, %v40_v5, 0.0  ;;  %67 = vst [vmem:[#allocation1] ss:$2 sm:$0xff] %v63_v2 }
  0x10   :  { %v52_v8 = vadd.f32 %v51_v7, %v50_v6  ;;  %v43_v9 = vld.sshfl [vmem:[#allocation1 + $0x10] sm:$0xff pattern:$0x75316420]  ;;  %v44_v10 = vld.sshfl [vmem:[#allocation1 + $0x18] sm:$0xff pattern:$0x75316420] }
  0x11   :  { %71 = vst [vmem:[#allocation1 + $0x10] ss:$2 sm:$0xff] %v64_v3  ;;  %v55_v11 = vsel %vm49_vm0, %v43_v9, 0.0  ;;  %v56_v12 = vsel %vm49_vm0, %v44_v10, 0.0 }
  0x12   :  { %53 = vadd.xlane.f32.xlu0 %v52_v8  ;;  %v57_v15 = vadd.f32 %v56_v12, %v55_v11 }
  0x16   :  { %v68_v13 = vld.sshfl [vmem:[#allocation1] sm:$0xff pattern:$0x75316420]  ;;  %v69_v14 = vld.sshfl [vmem:[#allocation1 + $0x8] sm:$0xff pattern:$0x75316420] }
  0x17   :  { %v78_v16 = vsel %vm49_vm0, %v68_v13, 0.0  ;;  %v79_v17 = vsel %vm49_vm0, %v69_v14, 0.0 }
  0x18   :  { %v80_v18 = vadd.f32 %v79_v17, %v78_v16  ;;  %v72_v19 = vld.sshfl [vmem:[#allocation1 + $0x10] sm:$0xff pattern:$0x75316420]  ;;  %v73_v20 = vld.sshfl [vmem:[#allocation1 + $0x18] sm:$0xff pattern:$0x75316420] }
  0x19   :  { %v83_v21 = vsel %vm49_vm0, %v72_v19, 0.0  ;;  %v84_v22 = vsel %vm49_vm0, %v73_v20, 0.0 }
  0x1a   :  { %81 = vadd.xlane.f32.xlu1 %v80_v18  ;;  %58 = vadd.xlane.f32.xlu0 %v57_v15  ;;  %v85_v23 = vadd.f32 %v84_v22, %v83_v21 }
  0x22   :  { %86 = vadd.xlane.f32.xlu1 %v85_v23 }
  0x2e   :  { %139 = vperm.xlu0 %199, %v136_v25  }
  0x85   :  { %v54_v24 = vpop.xlane.xlu0 %53 }
  0x86   :  { %v60_v30 = vsel %vm49_vm0, %v54_v24, 0.0 }
  0x8d   :  { %v82_v27 = vpop.xlane.xlu1 %81  ;;  %v59_v28 = vpop.xlane.xlu0 %58 }
  0x8e   :  { %v61_v29 = vsel %vm49_vm0, %v59_v28, 0.0  ;;  %v88_v34 = vsel %vm49_vm0, %v82_v27, 0.0 }
  0x8f   :  { %v62_v31 = vadd.f32 %v61_v29, %v60_v30 }
  0x91   :  { %v91_v32 = vmul.f32 0.001953125, %v62_v31 }
  0x93   :  { %v93_v37 = vmul.f32 %v91_v32, %v91_v32 }
  0x95   :  { %v87_v33 = vpop.xlane.xlu1 %86 }
  0x96   :  { %v89_v35 = vsel %vm49_vm0, %v87_v33, 0.0 }
  0x97   :  { %v90_v36 = vadd.f32 %v89_v35, %v88_v34 }
  0x99   :  { %v92_v38 = vmul.f32 0.001953125, %v90_v36 }
  0x9b   :  { %v94_v39 = vsub.f32 %v92_v38, %v93_v37 }
  0x9d   :  { %v95_v40 = vmax.f32 %v94_v39, 0.0 }
  0x9f   :  { %v97_v41 = vadd.f32 0.001, %v95_v40 }
  0xa0   :  { %v140_v3 = vpop.permute.xlu0 %139 }
  0xa1   :  { %200 = vrsqrt.f32 %v97_v41  ;;  %vm104_vm2 = vweird.f32 %v97_v41 }
  0xa7   :  { %v201_v42 = vpop.eup %200 }
  0xa8   :  { %v99_v43 = vmul.f32 %v201_v42, %v97_v41  ;;  %vm105_vm1 = vweird.f32 %v201_v42 }
  0xa9   :  { %vm106_vm3 = vmor %vm104_vm2, %vm105_vm1 }
  0xaa   :  { %v100_v44 = vmul.f32 %v201_v42, %v99_v43 }
  0xac   :  { %v101_v45 = vmul.f32 0.5, %v100_v44 }
  0xae   :  { %v102_v46 = vsub.f32 1.5, %v101_v45 }
  0xb0   :  { %v103_v48 = vmul.f32 %v201_v42, %v102_v46 }
  0xb2   :  { %v107_v49 = vsel %vm106_vm3, %v201_v42, %v103_v48 }
  0xb3   :  { %v108_v50 = vmul.f32 %v107_v49, %v96_v47 }
  0xb5   :  { %114 = vperm.xlu2 %198, %v108_v50   ;;  %v110_v51 = vmul.f32 %v108_v50, %v91_v32 }
  0xb7   :  { %v111_v53 = vsub.f32 %v109_v52, %v110_v51 }
  0xbd   :  { %125 = vperm.xlu2 %198, %v111_v53  }
 0x10f   :  { %v115_v56 = vpop.permute.xlu2 %114 }
 0x110   :  { %v119_v58 = vperm.slane %v115_v56, %v118_v57 }
 0x112   :  { %v121_v60 = vmul.f32 %v119_v58, %v291_v0  ;;  %v122_v61 = vmul.f32 %v119_v58, %v293_v1 }
 0x117   :  { %v126_v59 = vpop.permute.xlu2 %125 }
 0x118   :  { %v130_v62 = vperm.slane %v126_v59, %v118_v57 }
 0x11a   :  { %v132_v63 = vadd.f32 %v130_v62, %v121_v60  ;;  %v133_v2 = vadd.f32 %v130_v62, %v122_v61 }
 0x11c   :  { %144 = vst [vmem:[#allocation1] ss:$2 sm:$0xff] %v132_v63  ;;  %vm134_vm4 = vcmp.ge.f32.partialorder %v132_v63, 0.0  ;;  %vm135_vm5 = vcmp.ge.f32.partialorder %v133_v2, 0.0 }
 0x11d   :  { %148 = vst [vmem:[#allocation1 + $0x10] ss:$2 sm:$0xff] %v133_v2 }
 0x123   :  { %v145_v4 = vld.sshfl [vmem:[#allocation1] sm:$0xff pattern:$0x75316420]  ;;  %v146_v5 = vld.sshfl [vmem:[#allocation1 + $0x8] sm:$0xff pattern:$0x75316420] }
 0x124   :  { %v149_v6 = vld.sshfl [vmem:[#allocation1 + $0x10] sm:$0xff pattern:$0x75316420]  ;;  %v150_v7 = vld.sshfl [vmem:[#allocation1 + $0x18] sm:$0xff pattern:$0x75316420]  ;;  %v156_v8 = vmul.f32 %v146_v5, %v140_v3  ;;  %v155_v10 = vmul.f32 %v145_v4, %v140_v3 }
 0x125   :  { %v158_v9 = vmul.f32 %v150_v7, %v140_v3  ;;  %v157_v0 = vmul.f32 %v149_v6, %v140_v3 }
 0x126   :  { %v163_v11 = vrot.slane %v156_v8, 4 }
 0x127   :  { %v164_v1 = vrot.slane %v158_v9, 4 }
 0x128   :  { %v165_v12 = vsel %vm49_vm0, %v155_v10, %v163_v11 }
 0x129   :  { %v166_v13 = vsel %vm49_vm0, %v157_v0, %v164_v1  ;;  %v169_v14 = vsel %vm134_vm4, %v132_v63, %v165_v12 }
 0x12a   :  { %v170_v15 = vsel %vm135_vm5, %v133_v2, %v166_v13  ;;  %171 = vst [vmem:[#allocation5] sm:$0xff] %v169_v14 }
 0x12b   :  { %172 = vst [vmem:[#allocation5 + $0x8] sm:$0xff] %v170_v15 }
 0x12c   :  { %185 = dma.vmem_to_hbm [thread:$0]  %s178_s2, 256, %s180_s28, [#allocation4], %s255_s20, %s255_s20, %s256_s21  }
 0x12d   :  { %252 = dma.done.wait [#allocation4], 256  }
 0x12e   :  { %253 = vsyncadd [#allocation4], 4294967040 }
 0x12f   :  { %190 = vsyncpa [#allocation3], 1 }
 0x130   :  { %191 = vsyncpa [#allocation4], 1 }

</bundles_post_ra>
